<compile_context>
chip_gen: v5e
topology: v5e:2x2
jax: 0.10.0
libtpu: 0.0.40
codegen_flags: <defaults>
</compile_context>

<pallas_src>
import functools

import jax
import jax.numpy as jnp
from jax.experimental import pallas as pl
from jax.experimental.pallas import tpu as pltpu

LANE = 128         # lane grain: hidden/output feature axes padded once to multiples of this
SUBLANE = 8        # sublane grain on the batch axis
MAX_TILE_B = 1024  # max batch rows per grid step (85%+ of HBM roofline; ~1.5 MiB VMEM)
SPLIT_B = 256      # above this many rows, force >= 2 batch tiles (v7x dual-TensorCore)


def _round_up(n, m):
    return ((n + m - 1) // m) * m


def qnet_kernel(x_ref, w1_ref, b1_ref, w2_ref, b2_ref, w3_ref, b3_ref, o_ref):
    """Fused MLP on one batch tile.

    Matmul operands are bf16 (native MXU dtype), accumulation is f32
    (preferred_element_type); bias-add / ReLU epilogues stay f32 on the VPU.
    x arrives with its real (unpadded) feature width; w1 is padded only on its
    output dim, so the first dot is (tile_b, in) @ (in, hid_p).
    """
    x = x_ref[...].astype(jnp.bfloat16)
    # Layer 1: Linear + ReLU
    h1 = jnp.dot(x, w1_ref[...], preferred_element_type=jnp.float32)
    h1 = jnp.maximum(h1 + b1_ref[...], 0.0)
    # Layer 2: Linear + ReLU
    h2 = jnp.dot(h1.astype(jnp.bfloat16), w2_ref[...], preferred_element_type=jnp.float32)
    h2 = jnp.maximum(h2 + b2_ref[...], 0.0)
    # Layer 3: Linear (no activation) -> lane-dense padded store
    out = jnp.dot(h2.astype(jnp.bfloat16), w3_ref[...], preferred_element_type=jnp.float32)
    o_ref[...] = (out + b3_ref[...]).astype(o_ref.dtype)


def init_params(key, input_size, hidden_size, output_size):
    """Deterministic parameter init (uniform, PyTorch-Linear-style bounds).

    Weights are stored transposed from PyTorch convention as [in, out] so the
    kernel computes y = x @ W + b directly on the MXU; biases are [1, out].
    """
    ks = jax.random.split(key, 6)

    def linear(kw, kb, fan_in, fan_out):
        bound = 1.0 / jnp.sqrt(float(fan_in))
        w = jax.random.uniform(kw, (fan_in, fan_out), jnp.float32, -bound, bound)
        b = jax.random.uniform(kb, (1, fan_out), jnp.float32, -bound, bound)
        return w, b

    w1, b1 = linear(ks[0], ks[1], input_size, hidden_size)
    w2, b2 = linear(ks[2], ks[3], hidden_size, hidden_size)
    w3, b3 = linear(ks[4], ks[5], hidden_size, output_size)
    return {"w1": w1, "b1": b1, "w2": w2, "b2": b2, "w3": w3, "b3": b3}


def pad_params(params):
    """One-time pad of hidden/output dims to 128 lanes + bf16 cast of the weights.

    Zero padding is exact: padded hidden units get zero weight columns and zero
    bias -> ReLU(0)=0 -> contribute nothing downstream; padded output columns
    are sliced away by the wrapper.  w1 keeps its real INPUT dim so x can be
    read unpadded.  Biases stay f32 (epilogue precision).
    """
    in_size, hid_size = params["w1"].shape
    out_size = params["w3"].shape[1]
    hid_p = _round_up(hid_size, LANE)
    out_p = _round_up(out_size, LANE)

    def pad2(a, rows, cols, dtype):
        out = jnp.zeros((rows, cols), dtype)
        return out.at[: a.shape[0], : a.shape[1]].set(a.astype(dtype))

    return {
        "w1": pad2(params["w1"], in_size, hid_p, jnp.bfloat16),
        "b1": pad2(params["b1"], 1, hid_p, jnp.float32),
        "w2": pad2(params["w2"], hid_p, hid_p, jnp.bfloat16),
        "b2": pad2(params["b2"], 1, hid_p, jnp.float32),
        "w3": pad2(params["w3"], hid_p, out_p, jnp.bfloat16),
        "b3": pad2(params["b3"], 1, out_p, jnp.float32),
        "_sizes": (in_size, out_size),
    }


@functools.partial(jax.jit, static_argnames=("input_size", "output_size"))
def _qnetwork_forward_padded(x, w1, b1, w2, b2, w3, b3, *, input_size, output_size):
    B = x.shape[0]
    out_p = w3.shape[1]
    x = x.astype(jnp.float32)

    # Batch tiling:
    #  * B <= SPLIT_B: one full-array block (block dims == array dims, so no sublane
    #    alignment or batch padding needed).  Latency-bound regime; batch more states
    #    per call upstream to amortize the fixed cost.
    #  * B  > SPLIT_B: >= 2 sublane-aligned tiles (so v7x's two TensorCores split the
    #    "parallel" batch axis), capped at MAX_TILE_B rows.  Only the narrow batch axis
    #    is zero-padded (at the real feature width), and only if B doesn't divide.
    if B <= SPLIT_B:
        tile_b = B
        b_pad = B
    else:
        tile_b = min(MAX_TILE_B, _round_up(-(-B // 2), SUBLANE))
        b_pad = _round_up(B, tile_b)
        if b_pad != B:
            x = jnp.zeros((b_pad, input_size), jnp.float32).at[:B].set(x)

    grid = (b_pad // tile_b,)

    # Constant index_map -> weights/biases are DMA'd once and stay VMEM-resident
    # across the batch grid.
    resident = lambda shape: pl.BlockSpec(shape, lambda i: (0, 0))

    out_padded = pl.pallas_call(
        qnet_kernel,
        out_shape=jax.ShapeDtypeStruct((b_pad, out_p), jnp.float32),
        grid=grid,
        in_specs=[
            pl.BlockSpec((tile_b, input_size), lambda i: (i, 0)),  # x: unpadded features
            resident(w1.shape), resident(b1.shape),                # weights: VMEM-resident
            resident(w2.shape), resident(b2.shape),
            resident(w3.shape), resident(b3.shape),
        ],
        out_specs=pl.BlockSpec((tile_b, out_p), lambda i: (i, 0)),
        compiler_params=pltpu.CompilerParams(
            dimension_semantics=("parallel",),                      # v7x dual-TC sharding
        ),
    )(x, w1, b1, w2, b2, w3, b3)

    return out_padded[:B, :output_size]


def qnetwork_forward(x, padded_params):
    """x: [B, input_size] float32. padded_params: output of pad_params()."""
    input_size, output_size = padded_params["_sizes"]
    return _qnetwork_forward_padded(
        x,
        padded_params["w1"], padded_params["b1"],
        padded_params["w2"], padded_params["b2"],
        padded_params["w3"], padded_params["b3"],
        input_size=int(input_size), output_size=int(output_size),
    )


def qnetwork_reference(x, params):
    """Pure-JAX reference using the same bf16-operand / f32-accumulate recipe."""
    def dense(h, w, b):
        return jnp.dot(h.astype(jnp.bfloat16), w.astype(jnp.bfloat16),
                       preferred_element_type=jnp.float32) + b

    h1 = jnp.maximum(dense(x, params["w1"], params["b1"]), 0.0)
    h2 = jnp.maximum(dense(h1, params["w2"], params["b2"]), 0.0)
    return dense(h2, params["w3"], params["b3"])


if __name__ == "__main__":
    input_size, hidden_size, output_size = 16, 32, 4
    batch = 8

    key = jax.random.PRNGKey(0)
    kx, kp, kx2 = jax.random.split(key, 3)
    params = init_params(kp, input_size, hidden_size, output_size)
    padded = pad_params(params)   # one-time pad + bf16 cast, reused across calls

    # Small-batch (single-tile, grid=1) path.
    x = jax.random.normal(kx, (batch, input_size), jnp.float32)
    out = jax.block_until_ready(qnetwork_forward(x, padded))
    ref = qnetwork_reference(x, params)
    assert out.shape == (batch, output_size)
    assert jnp.allclose(out, ref, atol=1e-2, rtol=1e-2), "mismatch (single-tile path)"

    # Multi-tile path (>=2 grid points, batch-axis padding of the tail tile).
    x2 = jax.random.normal(kx2, (300, input_size), jnp.float32)
    out2 = jax.block_until_ready(qnetwork_forward(x2, padded))
    ref2 = qnetwork_reference(x2, params)
    assert out2.shape == (300, output_size)
    assert jnp.allclose(out2, ref2, atol=1e-2, rtol=1e-2), "mismatch (multi-tile path)"

    print("KERNEL_OK")
</pallas_src>

<mosaic_0001>
module attributes {stable_mosaic.version = 11 : i64} {
  func.func @qnet_kernel(%arg0: i32, %arg1: memref<8x16xf32, #tpu.memory_space<vmem>>, %arg2: memref<16x128xbf16, #tpu.memory_space<vmem>>, %arg3: memref<1x128xf32, #tpu.memory_space<vmem>>, %arg4: memref<128x128xbf16, #tpu.memory_space<vmem>>, %arg5: memref<1x128xf32, #tpu.memory_space<vmem>>, %arg6: memref<128x128xbf16, #tpu.memory_space<vmem>>, %arg7: memref<1x128xf32, #tpu.memory_space<vmem>>, %arg8: memref<8x128xf32, #tpu.memory_space<vmem>>) attributes {dimension_semantics = [#tpu.dimension_semantics<parallel>], iteration_bounds = array<i64: 1>, scalar_prefetch = 0 : i64, scratch_operands = 0 : i64, tpu.core_type = #tpu.core_type<tc>, window_params = [{transform_indices = @transform_0, window_bounds = array<i64: 8, 16>}, {pipeline_mode = #tpu.pipeline_mode<synchronous>, transform_indices = @transform_1, window_bounds = array<i64: 16, 128>}, {pipeline_mode = #tpu.pipeline_mode<synchronous>, transform_indices = @transform_2, window_bounds = array<i64: 1, 128>}, {pipeline_mode = #tpu.pipeline_mode<synchronous>, transform_indices = @transform_3, window_bounds = array<i64: 128, 128>}, {pipeline_mode = #tpu.pipeline_mode<synchronous>, transform_indices = @transform_4, window_bounds = array<i64: 1, 128>}, {pipeline_mode = #tpu.pipeline_mode<synchronous>, transform_indices = @transform_5, window_bounds = array<i64: 128, 128>}, {pipeline_mode = #tpu.pipeline_mode<synchronous>, transform_indices = @transform_6, window_bounds = array<i64: 1, 128>}, {transform_indices = @transform_7, window_bounds = array<i64: 8, 128>}]} {
    %c0 = arith.constant 0 : index
    %c0_0 = arith.constant 0 : index
    %0 = vector.load %arg1[%c0, %c0_0] : memref<8x16xf32, #tpu.memory_space<vmem>>, vector<8x16xf32>
    %1 = arith.truncf %0 : vector<8x16xf32> to vector<8x16xbf16>
    %c0_1 = arith.constant 0 : index
    %c0_2 = arith.constant 0 : index
    %2 = vector.load %arg2[%c0_1, %c0_2] : memref<16x128xbf16, #tpu.memory_space<vmem>>, vector<16x128xbf16>
    %cst = arith.constant dense<0.000000e+00> : vector<8x128xf32>
    %3 = tpu.matmul %1, %2, %cst {dimension_numbers = #tpu.dot_dimension_numbers<[1], [0], [0], [1], [0, 0, 1, 1], [], []>} : vector<8x16xbf16>, vector<16x128xbf16>, vector<8x128xf32> -> vector<8x128xf32>
    %c0_3 = arith.constant 0 : index
    %c0_4 = arith.constant 0 : index
    %4 = vector.load %arg3[%c0_3, %c0_4] : memref<1x128xf32, #tpu.memory_space<vmem>>, vector<1x128xf32>
    %5 = vector.broadcast %4 : vector<1x128xf32> to vector<8x128xf32>
    %6 = arith.addf %3, %5 : vector<8x128xf32>
    %cst_5 = arith.constant 0.000000e+00 : f32
    %7 = vector.broadcast %cst_5 : f32 to vector<8x128xf32>
    %8 = arith.maximumf %6, %7 : vector<8x128xf32>
    %9 = arith.truncf %8 : vector<8x128xf32> to vector<8x128xbf16>
    %c0_6 = arith.constant 0 : index
    %c0_7 = arith.constant 0 : index
    %10 = vector.load %arg4[%c0_6, %c0_7] : memref<128x128xbf16, #tpu.memory_space<vmem>>, vector<128x128xbf16>
    %cst_8 = arith.constant dense<0.000000e+00> : vector<8x128xf32>
    %11 = tpu.matmul %9, %10, %cst_8 {dimension_numbers = #tpu.dot_dimension_numbers<[1], [0], [0], [1], [0, 0, 1, 1], [], []>} : vector<8x128xbf16>, vector<128x128xbf16>, vector<8x128xf32> -> vector<8x128xf32>
    %c0_9 = arith.constant 0 : index
    %c0_10 = arith.constant 0 : index
    %12 = vector.load %arg5[%c0_9, %c0_10] : memref<1x128xf32, #tpu.memory_space<vmem>>, vector<1x128xf32>
    %13 = vector.broadcast %12 : vector<1x128xf32> to vector<8x128xf32>
    %14 = arith.addf %11, %13 : vector<8x128xf32>
    %cst_11 = arith.constant 0.000000e+00 : f32
    %15 = vector.broadcast %cst_11 : f32 to vector<8x128xf32>
    %16 = arith.maximumf %14, %15 : vector<8x128xf32>
    %17 = arith.truncf %16 : vector<8x128xf32> to vector<8x128xbf16>
    %c0_12 = arith.constant 0 : index
    %c0_13 = arith.constant 0 : index
    %18 = vector.load %arg6[%c0_12, %c0_13] : memref<128x128xbf16, #tpu.memory_space<vmem>>, vector<128x128xbf16>
    %cst_14 = arith.constant dense<0.000000e+00> : vector<8x128xf32>
    %19 = tpu.matmul %17, %18, %cst_14 {dimension_numbers = #tpu.dot_dimension_numbers<[1], [0], [0], [1], [0, 0, 1, 1], [], []>} : vector<8x128xbf16>, vector<128x128xbf16>, vector<8x128xf32> -> vector<8x128xf32>
    %c0_15 = arith.constant 0 : index
    %c0_16 = arith.constant 0 : index
    %20 = vector.load %arg7[%c0_15, %c0_16] : memref<1x128xf32, #tpu.memory_space<vmem>>, vector<1x128xf32>
    %21 = vector.broadcast %20 : vector<1x128xf32> to vector<8x128xf32>
    %22 = arith.addf %19, %21 : vector<8x128xf32>
    %c0_17 = arith.constant 0 : index
    %c0_18 = arith.constant 0 : index
    %23 = vector.load %arg8[%c0_17, %c0_18] : memref<8x128xf32, #tpu.memory_space<vmem>>, vector<8x128xf32>
    tpu.vector_store %arg8[%c0_17, %c0_18], %22 {strides = array<i32>} : memref<8x128xf32, #tpu.memory_space<vmem>>, vector<8x128xf32>,
    return
  }
  func.func @transform_0(%arg0: i32) -> (i32, i32) {
    %c0_i32 = arith.constant 0 : i32
    %c0_i32_0 = arith.constant 0 : i32
    return %arg0, %c0_i32 : i32, i32
  }
  func.func @transform_1(%arg0: i32) -> (i32, i32) {
    %c0_i32 = arith.constant 0 : i32
    %c0_i32_0 = arith.constant 0 : i32
    %c0_i32_1 = arith.constant 0 : i32
    return %c0_i32, %c0_i32_0 : i32, i32
  }
  func.func @transform_2(%arg0: i32) -> (i32, i32) {
    %c0_i32 = arith.constant 0 : i32
    %c0_i32_0 = arith.constant 0 : i32
    %c0_i32_1 = arith.constant 0 : i32
    return %c0_i32, %c0_i32_0 : i32, i32
  }
  func.func @transform_3(%arg0: i32) -> (i32, i32) {
    %c0_i32 = arith.constant 0 : i32
    %c0_i32_0 = arith.constant 0 : i32
    %c0_i32_1 = arith.constant 0 : i32
    return %c0_i32, %c0_i32_0 : i32, i32
  }
  func.func @transform_4(%arg0: i32) -> (i32, i32) {
    %c0_i32 = arith.constant 0 : i32
    %c0_i32_0 = arith.constant 0 : i32
    %c0_i32_1 = arith.constant 0 : i32
    return %c0_i32, %c0_i32_0 : i32, i32
  }
  func.func @transform_5(%arg0: i32) -> (i32, i32) {
    %c0_i32 = arith.constant 0 : i32
    %c0_i32_0 = arith.constant 0 : i32
    %c0_i32_1 = arith.constant 0 : i32
    return %c0_i32, %c0_i32_0 : i32, i32
  }
  func.func @transform_6(%arg0: i32) -> (i32, i32) {
    %c0_i32 = arith.constant 0 : i32
    %c0_i32_0 = arith.constant 0 : i32
    %c0_i32_1 = arith.constant 0 : i32
    return %c0_i32, %c0_i32_0 : i32, i32
  }
  func.func @transform_7(%arg0: i32) -> (i32, i32) {
    %c0_i32 = arith.constant 0 : i32
    %c0_i32_0 = arith.constant 0 : i32
    return %arg0, %c0_i32 : i32, i32
  }
}

</mosaic_0001>

<bundles_post_ra>
// kernel: _qnetwork_forward_padded.1
= control target key start
LH: loop header
LB: loop body
LE: loop exit
PB: predicated region body
PF: predicated region fallthrough
CT: control target
= control target key end

     0   :  { %12 = vsyncpa [#allocation3], 0  ;;  %s560_s0 = inlined_call_operand.hbm [shape: f32[8,16], index: 0, kind: input, shape index: {}]   ;;  %s561_s1 = inlined_call_operand.hbm [shape: bf16[16,128], index: 1, kind: input, shape index: {}]   ;;  %s562_s2 = inlined_call_operand.vmem [shape: f32[1,128], index: 2, kind: input, shape index: {}]   ;;  %s563_s3 = inlined_call_operand.hbm [shape: bf16[128,128], index: 3, kind: input, shape index: {}]   ;;  %s564_s4 = inlined_call_operand.vmem [shape: f32[1,128], index: 4, kind: input, shape index: {}]   ;;  %s565_s5 = inlined_call_operand.hbm [shape: bf16[128,128], index: 5, kind: input, shape index: {}]   ;;  %s566_s6 = inlined_call_operand.vmem [shape: f32[1,128], index: 6, kind: input, shape index: {}]   ;;  %s567_s7 = inlined_call_operand.vmem [shape: f32[8,128], index: 7, kind: output, shape index: {}]  }
   0x1   :  { %13 = vsyncpa [#allocation5], 0  ;;  %s30_s26 = sshll.u32 %s561_s1, 4  ;;  %s31_s26 = int_to_ptr.hbm [resolvable:$true] %s30_s26 }
   0x2   :  { %14 = vsyncpa [#allocation8], 0  ;;  %s490_s27 = smov [#allocation4]   ;;  %s20_s8 = sshll.u32 %s560_s0, 4  ;;  %s21_s8 = int_to_ptr.hbm [resolvable:$true] %s20_s8 }
   0x3   :  { %s32_s28 = sshll.u32 %s490_s27, 4  ;;  %s491_s9 = smov 64   ;;  %s33_s28 = int_to_ptr.vmem [resolvable:$true] %s32_s28 }
   0x4   :  { %s492_s10 = smov 4   ;;  %s493_s11 = smov [#allocation2]  }
   0x5   :  { %38 = dma.hbm_to_vmem [thread:$0]  %s31_s26, 128, %s33_s28, [#allocation5], %s491_s9, %s491_s9, %s492_s10  }
   0x6   :  { %s22_s12 = sshll.u32 %s493_s11, 4  ;;  %s45_s15 = sshll.u32 %s563_s3, 4  ;;  %s23_s12 = int_to_ptr.vmem [resolvable:$true] %s22_s12  ;;  %s46_s15 = int_to_ptr.hbm [resolvable:$true] %s45_s15 }
   0x7   :  { %25 = dma.hbm_to_vmem [thread:$0]  %s21_s8, 128, %s23_s12, [#allocation3]  }
   0x8   :  { %s60_s17 = sshll.u32 %s565_s5, 4  ;;  %s494_s18 = smov [#allocation6]   ;;  %s61_s17 = int_to_ptr.hbm [resolvable:$true] %s60_s17 }
   0x9   :  { %s47_s19 = sshll.u32 %s494_s18, 4  ;;  %s495_s0 = smov [#allocation7]   ;;  %s48_s19 = int_to_ptr.vmem [resolvable:$true] %s47_s19 }
   0xa   :  { %53 = dma.hbm_to_vmem [thread:$0]  %s46_s15, 1024, %s48_s19, [#allocation5], %s491_s9, %s491_s9, %s492_s10  }
   0xb   :  { %s62_s20 = sshll.u32 %s495_s0, 4  ;;  %s63_s20 = int_to_ptr.vmem [resolvable:$true] %s62_s20 }
   0xc   :  { %68 = dma.hbm_to_vmem [thread:$0]  %s61_s17, 1024, %s63_s20, [#allocation8], %s491_s9, %s491_s9, %s492_s10  }
   0xd   :  { %484 = dma.done.wait [#allocation3], 128  }
   0xe   :  { %485 = vsyncadd [#allocation3], 4294967168 }
   0xf   :  { %486 = dma.done.wait [#allocation5], 1152  }
  0x10   :  { %487 = vsyncadd [#allocation5], 4294966144 }
  0x11   :  { %488 = dma.done.wait [#allocation8], 1024  }
  0x12   :  { %489 = vsyncadd [#allocation8], 4294966272  ;;  %v362_v0 = vld [vmem:[#allocation4] sm:$0xff]  ;;  %v88_v1 = vld [vmem:[#allocation2] sm:$0xff]  ;;  %vm102_vm0 = vcmask 130048  }
  0x13   :  { %v370_v2 = vld [vmem:[#allocation6 + $0x38] sm:$0xff]  ;;  %v89_v3 = vpack.c.bf16 %v88_v1, %v88_v1  ;;  %113 = vmatpush.bf16.msra.mxu0 %v362_v0  ;;  %v369_v4 = vld [vmem:[#allocation6 + $0x30] sm:$0xff]  ;;  %v368_v5 = vld [vmem:[#allocation6 + $0x28] sm:$0xff] }
  0x14   :  { %189 = vmatpush.bf16.msra.mxu1 %v370_v2  ;;  %v367_v6 = vld [vmem:[#allocation6 + $0x20] sm:$0xff]  ;;  %v366_v7 = vld [vmem:[#allocation6 + $0x18] sm:$0xff]  ;;  %v365_v8 = vld [vmem:[#allocation6 + $0x10] sm:$0xff] }
  0x15   :  { %v364_v9 = vld [vmem:[#allocation6 + $0x8] sm:$0xff]  ;;  %v363_v10 = vld [vmem:[#allocation6] sm:$0xff]  ;;  %v378_v11 = vld [vmem:[#allocation7 + $0x38] sm:$0xff] }
  0x16   :  { %297 = vmatmul.msk.bf16.vlgmr.msra.gmra.mxu0 %vm102_vm0, %v89_v3  ;;  %272 = vmatpush.bf16.msra.mxu2 %v378_v11  ;;  %v377_v12 = vld [vmem:[#allocation7 + $0x30] sm:$0xff]  ;;  %v376_v13 = vld [vmem:[#allocation7 + $0x28] sm:$0xff]  ;;  %v375_v14 = vld [vmem:[#allocation7 + $0x20] sm:$0xff] }
  0x17   :  { %v374_v15 = vld [vmem:[#allocation7 + $0x18] sm:$0xff]  ;;  %v373_v16 = vld [vmem:[#allocation7 + $0x10] sm:$0xff]  ;;  %v372_v23 = vld [vmem:[#allocation7 + $0x8] sm:$0xff] }
  0x18   :  { %190 = vmatpush.bf16.msra.mxu1 %v369_v4  ;;  %v385_v17 = vld [vmem:[%s562_s2] ss:$0 sm:$0xff]  ;;  %v371_v24 = vld [vmem:[#allocation7] sm:$0xff] }
  0x19   :  { %v386_v25 = vld [vmem:[%s564_s4] ss:$0 sm:$0xff] }
  0x1a   :  { %273 = vmatpush.bf16.msra.mxu2 %v377_v12  ;;  %v387_v31 = vld [vmem:[%s566_s6] ss:$0 sm:$0xff] }
  0x1c   :  { %191 = vmatpush.bf16.msra.mxu1 %v368_v5 }
  0x1e   :  { %274 = vmatpush.bf16.msra.mxu2 %v376_v13 }
  0x20   :  { %192 = vmatpush.bf16.msra.mxu1 %v367_v6 }
  0x22   :  { %275 = vmatpush.bf16.msra.mxu2 %v375_v14 }
  0x24   :  { %193 = vmatpush.bf16.msra.mxu1 %v366_v7 }
  0x26   :  { %276 = vmatpush.bf16.msra.mxu2 %v374_v15 }
  0x28   :  { %194 = vmatpush.bf16.msra.mxu1 %v365_v8 }
  0x2a   :  { %277 = vmatpush.bf16.msra.mxu2 %v373_v16 }
  0x2c   :  { %195 = vmatpush.bf16.msra.mxu1 %v364_v9 }
  0x2e   :  { %278 = vmatpush.bf16.msra.mxu2 %v372_v23 }
  0x30   :  { %196 = vmatpush.bf16.msra.mxu1 %v363_v10 }
  0x32   :  { %279 = vmatpush.bf16.msra.mxu2 %v371_v24 }
  0x93   :  { %v115_v18 = vpop.f32.mrf.mxu0 }
  0x94   :  { %v116_v19 = vadd.f32 %v385_v17, %v115_v18 }
  0x96   :  { %v119_v20 = vmax.f32 %v116_v19, 0.0 }
  0x98   :  { %v120_v21 = vpack.c.bf16 %v119_v20, %v119_v20 }
  0x9a   :  { %197 = vmatmul.bf16.vlgmr.msra.gmra.mxu1 %v120_v21 }
  0x9b   :  { %v117_v22 = vpop.f32.mrf.mxu0 }
 0x117   :  { %v198_v26 = vpop.f32.mrf.mxu1 }
 0x118   :  { %v199_v27 = vadd.f32 %v386_v25, %v198_v26 }
 0x11a   :  { %v202_v28 = vmax.f32 %v199_v27, 0.0 }
 0x11c   :  { %v203_v29 = vpack.c.bf16 %v202_v28, %v202_v28 }
 0x11e   :  { %280 = vmatmul.bf16.vlgmr.msra.gmra.mxu2 %v203_v29 }
 0x11f   :  { %v200_v30 = vpop.f32.mrf.mxu1 }
 0x1a1   :  { %v281_v32 = vpop.f32.mrf.mxu2 }
 0x1a2   :  { %v282_v33 = vadd.f32 %v387_v31, %v281_v32 }
 0x1a4   :  { %285 = vst [vmem:[%s567_s7] sm:$0xff] %v282_v33 }
 0x1a9   :  { %v283_v34 = vpop.f32.mrf.mxu2 }
 0x1aa   :  { %290 = vsyncpa [#allocation3], 1 }
 0x1ab   :  { %291 = vsyncpa [#allocation5], 1 }
 0x1ac   :  { %292 = vsyncpa [#allocation8], 1 }

</bundles_post_ra>
